<compile_context>
chip_gen: v7x
topology: tpu7x:2x2x1
jax: 0.10.0
libtpu: 0.0.40
codegen_flags: <defaults>
</compile_context>

<pallas_src>
from typing import Dict

import jax
import jax.numpy as jnp
from jax.experimental import pallas as pl
from jax.experimental.pallas import tpu as pltpu


# ---------------------------------------------------------------------------
# Fused Pallas kernel
# ---------------------------------------------------------------------------

def fused_multitask_kernel(patches_ref, cw_ref, cb_ref, pw_ref, pb_ref,
                           w1_ref, b1_ref, w2_ref, b2_ref,
                           o_ref, feats_ref):
    """One grid step = one image.

    patches_ref: (1, HW, K*K*Cin) bf16   cw_ref: (K*K*Cin, F) bf16   cb_ref: (1, F) f32
    pw_ref:      (F, D) bf16             pb_ref: (1, D) f32
    w1_ref:      (D, T*Dh) bf16          b1_ref: (1, T*Dh) f32
    w2_ref:      (T*Dh, OUT_PAD) bf16    b2_ref: (1, OUT_PAD) f32   (block-diagonal packing)
    o_ref:       (B, OUT_PAD) f32        feats_ref: VMEM scratch (B, F) f32
    """
    b = pl.program_id(0)
    hw = patches_ref.shape[1]

    # --- synthetic backbone: conv3x3 (im2col GEMM) + bias + ReLU, then global avg pool ---
    h = jnp.dot(patches_ref[0], cw_ref[...],
                preferred_element_type=jnp.float32)            # (HW, F), f32 accumulate
    h = jnp.maximum(h + cb_ref[...], 0.0)
    pooled = jnp.sum(h, axis=0, keepdims=True) * (1.0 / hw)    # (1, F) in-kernel pool
    feats_ref[pl.ds(b, 1), :] = pooled

    # --- last image: feature_proj + all task heads (packed, lane-dense output) ---
    @pl.when(b == pl.num_programs(0) - 1)
    def _():
        feats = feats_ref[...]                                  # (B, F) f32
        proj = jnp.dot(feats.astype(jnp.bfloat16), pw_ref[...],
                       preferred_element_type=jnp.float32)
        proj = jnp.maximum(proj + pb_ref[...], 0.0)             # Dropout = identity (eval)

        hid = jnp.dot(proj.astype(jnp.bfloat16), w1_ref[...],
                      preferred_element_type=jnp.float32)
        hid = jnp.maximum(hid + b1_ref[...], 0.0)               # Dropout = identity (eval)

        y = jnp.dot(hid.astype(jnp.bfloat16), w2_ref[...],
                    preferred_element_type=jnp.float32)
        o_ref[...] = y + b2_ref[...]                            # (B, OUT_PAD) lane-dense


# ---------------------------------------------------------------------------
# Parameter init (deterministic, PyTorch-like ranges, heads packed at init)
# ---------------------------------------------------------------------------

def _linear_init(key, fan_in, fan_out):
    """nn.Linear default: uniform(-1/sqrt(fan_in), 1/sqrt(fan_in)). Weight stored (in, out)."""
    kw, kb = jax.random.split(key)
    bound = 1.0 / float(fan_in) ** 0.5
    w = jax.random.uniform(kw, (fan_in, fan_out), jnp.float32, -bound, bound)
    b = jax.random.uniform(kb, (1, fan_out), jnp.float32, -bound, bound)
    return w, b


def _xavier_init(key, fan_in, fan_out, gain=0.1):
    """xavier_uniform_(gain=0.1) + zero bias, as in the final head layer."""
    bound = gain * (6.0 / (fan_in + fan_out)) ** 0.5
    w = jax.random.uniform(key, (fan_in, fan_out), jnp.float32, -bound, bound)
    b = jnp.zeros((1, fan_out), jnp.float32)
    return w, b


def init_params(key, in_ch: int, backbone_features: int, feature_dim: int,
                num_classes_dict: Dict[str, int], ksize: int = 3):
    tasks = list(num_classes_dict.keys())
    T = len(tasks)
    dh = feature_dim // 2
    total_cls = sum(num_classes_dict.values())
    out_pad = max(128, 128 * pl.cdiv(total_cls, 128))   # lane-dense packed output width

    keys = jax.random.split(key, 2 + 2 * T)
    conv_w, conv_b = _linear_init(keys[0], ksize * ksize * in_ch, backbone_features)
    proj_w, proj_b = _linear_init(keys[1], backbone_features, feature_dim)

    w1_blocks, b1_blocks = [], []
    w2_big = jnp.zeros((T * dh, out_pad), jnp.float32)
    b2_big = jnp.zeros((1, out_pad), jnp.float32)
    head_slices = {}
    off = 0
    for i, task in enumerate(tasks):
        n_cls = num_classes_dict[task]
        w1, b1 = _linear_init(keys[2 + 2 * i], feature_dim, dh)
        w2, b2 = _xavier_init(keys[3 + 2 * i], dh, n_cls, gain=0.1)
        w1_blocks.append(w1)
        b1_blocks.append(b1)
        w2_big = w2_big.at[i * dh:(i + 1) * dh, off:off + n_cls].set(w2)
        b2_big = b2_big.at[:, off:off + n_cls].set(b2)
        head_slices[task] = (off, n_cls)
        off += n_cls

    params = {
        # bf16 matmul operands (f32 accumulate in-kernel), f32 biases.
        "conv_w": conv_w.astype(jnp.bfloat16), "conv_b": conv_b,
        "proj_w": proj_w.astype(jnp.bfloat16), "proj_b": proj_b,
        "heads_w1": jnp.concatenate(w1_blocks, axis=1).astype(jnp.bfloat16),
        "heads_b1": jnp.concatenate(b1_blocks, axis=1),
        "heads_w2": w2_big.astype(jnp.bfloat16),
        "heads_b2": b2_big,
    }
    return params, head_slices, out_pad


# ---------------------------------------------------------------------------
# Forward
# ---------------------------------------------------------------------------

def _im2col(x_nchw, ksize=3, pad=1):
    """NCHW -> NHWC -> zero-pad -> patches (B, H*W, K*K*Cin) bf16.  Pure layout glue."""
    x = jnp.transpose(x_nchw, (0, 2, 3, 1))  # NHWC
    B, H, W, C = x.shape
    xp = jnp.pad(x, ((0, 0), (pad, pad), (pad, pad), (0, 0)))
    cols = [xp[:, kh:kh + H, kw:kw + W, :] for kh in range(ksize) for kw in range(ksize)]
    patches = jnp.concatenate(cols, axis=-1).reshape(B, H * W, ksize * ksize * C)
    return patches.astype(jnp.bfloat16), B, H * W


def multitask_cnn_forward(params, x_nchw, head_slices, out_pad):
    patches, B, hw = _im2col(x_nchw)
    kc = patches.shape[-1]
    feat = params["conv_w"].shape[1]

    packed = pl.pallas_call(
        fused_multitask_kernel,
        out_shape=jax.ShapeDtypeStruct((B, out_pad), jnp.float32),
        grid_spec=pltpu.PrefetchScalarGridSpec(
            num_scalar_prefetch=0,
            grid=(B,),
            in_specs=[
                pl.BlockSpec((1, hw, kc), lambda b: (b, 0, 0)),          # one image per step
                pl.BlockSpec(params["conv_w"].shape, lambda b: (0, 0)),  # weights resident
                pl.BlockSpec(params["conv_b"].shape, lambda b: (0, 0)),
                pl.BlockSpec(params["proj_w"].shape, lambda b: (0, 0)),
                pl.BlockSpec(params["proj_b"].shape, lambda b: (0, 0)),
                pl.BlockSpec(params["heads_w1"].shape, lambda b: (0, 0)),
                pl.BlockSpec(params["heads_b1"].shape, lambda b: (0, 0)),
                pl.BlockSpec(params["heads_w2"].shape, lambda b: (0, 0)),
                pl.BlockSpec(params["heads_b2"].shape, lambda b: (0, 0)),
            ],
            out_specs=pl.BlockSpec((B, out_pad), lambda b: (0, 0)),       # written on last step
            scratch_shapes=[pltpu.VMEM((B, feat), jnp.float32)],          # pooled feats
        ),
        compiler_params=pltpu.CompilerParams(
            # last grid step consumes scratch written by all previous steps
            dimension_semantics=("arbitrary",),
            vmem_limit_bytes=32 * 1024 * 1024,
        ),
    )(patches, params["conv_w"], params["conv_b"],
      params["proj_w"], params["proj_b"],
      params["heads_w1"], params["heads_b1"],
      params["heads_w2"], params["heads_b2"])

    # Slice per-task logits out of the lane-dense packed slab (static slices).
    return {task: packed[:, off:off + n] for task, (off, n) in head_slices.items()}


# ---------------------------------------------------------------------------
# Main
# ---------------------------------------------------------------------------

if __name__ == "__main__":
    key = jax.random.PRNGKey(0)
    k_x, k_p = jax.random.split(key)

    num_classes_dict = {"task_a": 5, "task_b": 3}
    B, C, H, W = 2, 4, 16, 16          # small NCHW image batch
    backbone_features, feature_dim = 32, 32

    x = jax.random.normal(k_x, (B, C, H, W), dtype=jnp.float32)
    params, head_slices, out_pad = init_params(
        k_p, C, backbone_features, feature_dim, num_classes_dict)

    forward = jax.jit(lambda p, xx: multitask_cnn_forward(p, xx, head_slices, out_pad))
    out = jax.block_until_ready(forward(params, x))

    assert set(out.keys()) == set(num_classes_dict.keys())
    for task, n_cls in num_classes_dict.items():
        assert out[task].shape == (B, n_cls), out[task].shape
        assert out[task].dtype == jnp.float32

    print("KERNEL_OK")
</pallas_src>

<mosaic_0001>
module attributes {stable_mosaic.version = 11 : i64} {
  func.func @fused_multitask_kernel(%arg0: i32, %arg1: memref<1x256x36xbf16, #tpu.memory_space<vmem>>, %arg2: memref<36x32xbf16, #tpu.memory_space<vmem>>, %arg3: memref<1x32xf32, #tpu.memory_space<vmem>>, %arg4: memref<32x32xbf16, #tpu.memory_space<vmem>>, %arg5: memref<1x32xf32, #tpu.memory_space<vmem>>, %arg6: memref<32x32xbf16, #tpu.memory_space<vmem>>, %arg7: memref<1x32xf32, #tpu.memory_space<vmem>>, %arg8: memref<32x128xbf16, #tpu.memory_space<vmem>>, %arg9: memref<1x128xf32, #tpu.memory_space<vmem>>, %arg10: memref<2x128xf32, #tpu.memory_space<vmem>>, %arg11: memref<2x32xf32, #tpu.memory_space<vmem>>) attributes {dimension_semantics = [#tpu.dimension_semantics<arbitrary>], iteration_bounds = array<i64: 2>, scalar_prefetch = 0 : i64, scratch_operands = 1 : i64, tpu.core_type = #tpu.core_type<tc>, window_params = [{transform_indices = @transform_0, window_bounds = array<i64: 1, 256, 36>}, {pipeline_mode = #tpu.pipeline_mode<synchronous>, transform_indices = @transform_1, window_bounds = array<i64: 36, 32>}, {pipeline_mode = #tpu.pipeline_mode<synchronous>, transform_indices = @transform_2, window_bounds = array<i64: 1, 32>}, {pipeline_mode = #tpu.pipeline_mode<synchronous>, transform_indices = @transform_3, window_bounds = array<i64: 32, 32>}, {pipeline_mode = #tpu.pipeline_mode<synchronous>, transform_indices = @transform_4, window_bounds = array<i64: 1, 32>}, {pipeline_mode = #tpu.pipeline_mode<synchronous>, transform_indices = @transform_5, window_bounds = array<i64: 32, 32>}, {pipeline_mode = #tpu.pipeline_mode<synchronous>, transform_indices = @transform_6, window_bounds = array<i64: 1, 32>}, {pipeline_mode = #tpu.pipeline_mode<synchronous>, transform_indices = @transform_7, window_bounds = array<i64: 32, 128>}, {pipeline_mode = #tpu.pipeline_mode<synchronous>, transform_indices = @transform_8, window_bounds = array<i64: 1, 128>}, {pipeline_mode = #tpu.pipeline_mode<synchronous>, transform_indices = @transform_9, window_bounds = array<i64: 2, 128>}]} {
    %c0 = arith.constant 0 : index
    %c0_0 = arith.constant 0 : index
    %c0_1 = arith.constant 0 : index
    %0 = vector.load %arg1[%c0, %c0_0, %c0_1] : memref<1x256x36xbf16, #tpu.memory_space<vmem>>, vector<1x256x36xbf16>
    %1 = vector.shape_cast %0 : vector<1x256x36xbf16> to vector<256x36xbf16>
    %c0_2 = arith.constant 0 : index
    %c0_3 = arith.constant 0 : index
    %2 = vector.load %arg2[%c0_2, %c0_3] : memref<36x32xbf16, #tpu.memory_space<vmem>>, vector<36x32xbf16>
    %cst = arith.constant dense<0.000000e+00> : vector<256x32xf32>
    %3 = tpu.matmul %1, %2, %cst {dimension_numbers = #tpu.dot_dimension_numbers<[1], [0], [0], [1], [0, 0, 1, 1], [], []>} : vector<256x36xbf16>, vector<36x32xbf16>, vector<256x32xf32> -> vector<256x32xf32>
    %c0_4 = arith.constant 0 : index
    %c0_5 = arith.constant 0 : index
    %4 = vector.load %arg3[%c0_4, %c0_5] : memref<1x32xf32, #tpu.memory_space<vmem>>, vector<1x32xf32>
    %5 = vector.broadcast %4 : vector<1x32xf32> to vector<256x32xf32>
    %6 = arith.addf %3, %5 : vector<256x32xf32>
    %cst_6 = arith.constant 0.000000e+00 : f32
    %7 = vector.broadcast %cst_6 : f32 to vector<256x32xf32>
    %8 = arith.maximumf %6, %7 : vector<256x32xf32>
    %cst_7 = arith.constant dense<0.000000e+00> : vector<32xf32>
    %9 = vector.multi_reduction <add>, %8, %cst_7 [0] : vector<256x32xf32> to vector<32xf32>
    %10 = vector.shape_cast %9 : vector<32xf32> to vector<1x32xf32>
    %cst_8 = arith.constant 3.906250e-03 : f32
    %11 = vector.broadcast %cst_8 : f32 to vector<1x32xf32>
    %12 = arith.mulf %10, %11 : vector<1x32xf32>
    %13 = arith.index_cast %arg0 : i32 to index
    %c0_9 = arith.constant 0 : index
    %14 = vector.load %arg11[%13, %c0_9] : memref<2x32xf32, #tpu.memory_space<vmem>>, vector<1x32xf32>
    tpu.vector_store %arg11[%13, %c0_9], %12 {strides = array<i32>} : memref<2x32xf32, #tpu.memory_space<vmem>>, vector<1x32xf32>,
    %c1_i32 = arith.constant 1 : i32
    %15 = arith.cmpi eq, %arg0, %c1_i32 : i32
    %16 = arith.extui %15 : i1 to i32
    %c0_i32 = arith.constant 0 : i32
    %17 = arith.cmpi ne, %16, %c0_i32 : i32
    scf.if %17 {
      %c0_10 = arith.constant 0 : index
      %c0_11 = arith.constant 0 : index
      %18 = vector.load %arg11[%c0_10, %c0_11] : memref<2x32xf32, #tpu.memory_space<vmem>>, vector<2x32xf32>
      %19 = arith.truncf %18 : vector<2x32xf32> to vector<2x32xbf16>
      %c0_12 = arith.constant 0 : index
      %c0_13 = arith.constant 0 : index
      %20 = vector.load %arg4[%c0_12, %c0_13] : memref<32x32xbf16, #tpu.memory_space<vmem>>, vector<32x32xbf16>
      %cst_14 = arith.constant dense<0.000000e+00> : vector<2x32xf32>
      %21 = tpu.matmul %19, %20, %cst_14 {dimension_numbers = #tpu.dot_dimension_numbers<[1], [0], [0], [1], [0, 0, 1, 1], [], []>} : vector<2x32xbf16>, vector<32x32xbf16>, vector<2x32xf32> -> vector<2x32xf32>
      %c0_15 = arith.constant 0 : index
      %c0_16 = arith.constant 0 : index
      %22 = vector.load %arg5[%c0_15, %c0_16] : memref<1x32xf32, #tpu.memory_space<vmem>>, vector<1x32xf32>
      %23 = vector.broadcast %22 : vector<1x32xf32> to vector<2x32xf32>
      %24 = arith.addf %21, %23 : vector<2x32xf32>
      %cst_17 = arith.constant 0.000000e+00 : f32
      %25 = vector.broadcast %cst_17 : f32 to vector<2x32xf32>
      %26 = arith.maximumf %24, %25 : vector<2x32xf32>
      %27 = arith.truncf %26 : vector<2x32xf32> to vector<2x32xbf16>
      %c0_18 = arith.constant 0 : index
      %c0_19 = arith.constant 0 : index
      %28 = vector.load %arg6[%c0_18, %c0_19] : memref<32x32xbf16, #tpu.memory_space<vmem>>, vector<32x32xbf16>
      %cst_20 = arith.constant dense<0.000000e+00> : vector<2x32xf32>
      %29 = tpu.matmul %27, %28, %cst_20 {dimension_numbers = #tpu.dot_dimension_numbers<[1], [0], [0], [1], [0, 0, 1, 1], [], []>} : vector<2x32xbf16>, vector<32x32xbf16>, vector<2x32xf32> -> vector<2x32xf32>
      %c0_21 = arith.constant 0 : index
      %c0_22 = arith.constant 0 : index
      %30 = vector.load %arg7[%c0_21, %c0_22] : memref<1x32xf32, #tpu.memory_space<vmem>>, vector<1x32xf32>
      %31 = vector.broadcast %30 : vector<1x32xf32> to vector<2x32xf32>
      %32 = arith.addf %29, %31 : vector<2x32xf32>
      %cst_23 = arith.constant 0.000000e+00 : f32
      %33 = vector.broadcast %cst_23 : f32 to vector<2x32xf32>
      %34 = arith.maximumf %32, %33 : vector<2x32xf32>
      %35 = arith.truncf %34 : vector<2x32xf32> to vector<2x32xbf16>
      %c0_24 = arith.constant 0 : index
      %c0_25 = arith.constant 0 : index
      %36 = vector.load %arg8[%c0_24, %c0_25] : memref<32x128xbf16, #tpu.memory_space<vmem>>, vector<32x128xbf16>
      %cst_26 = arith.constant dense<0.000000e+00> : vector<2x128xf32>
      %37 = tpu.matmul %35, %36, %cst_26 {dimension_numbers = #tpu.dot_dimension_numbers<[1], [0], [0], [1], [0, 0, 1, 1], [], []>} : vector<2x32xbf16>, vector<32x128xbf16>, vector<2x128xf32> -> vector<2x128xf32>
      %c0_27 = arith.constant 0 : index
      %c0_28 = arith.constant 0 : index
      %38 = vector.load %arg9[%c0_27, %c0_28] : memref<1x128xf32, #tpu.memory_space<vmem>>, vector<1x128xf32>
      %39 = vector.broadcast %38 : vector<1x128xf32> to vector<2x128xf32>
      %40 = arith.addf %37, %39 : vector<2x128xf32>
      %c0_29 = arith.constant 0 : index
      %c0_30 = arith.constant 0 : index
      %41 = vector.load %arg10[%c0_29, %c0_30] : memref<2x128xf32, #tpu.memory_space<vmem>>, vector<2x128xf32>
      tpu.vector_store %arg10[%c0_29, %c0_30], %40 {strides = array<i32>} : memref<2x128xf32, #tpu.memory_space<vmem>>, vector<2x128xf32>,
    } else {
    }
    return
  }
  func.func @transform_0(%arg0: i32) -> (i32, i32, i32) {
    %c0_i32 = arith.constant 0 : i32
    %c0_i32_0 = arith.constant 0 : i32
    %c0_i32_1 = arith.constant 0 : i32
    return %arg0, %c0_i32, %c0_i32_0 : i32, i32, i32
  }
  func.func @transform_1(%arg0: i32) -> (i32, i32) {
    %c0_i32 = arith.constant 0 : i32
    %c0_i32_0 = arith.constant 0 : i32
    %c0_i32_1 = arith.constant 0 : i32
    return %c0_i32, %c0_i32_0 : i32, i32
  }
  func.func @transform_2(%arg0: i32) -> (i32, i32) {
    %c0_i32 = arith.constant 0 : i32
    %c0_i32_0 = arith.constant 0 : i32
    %c0_i32_1 = arith.constant 0 : i32
    return %c0_i32, %c0_i32_0 : i32, i32
  }
  func.func @transform_3(%arg0: i32) -> (i32, i32) {
    %c0_i32 = arith.constant 0 : i32
    %c0_i32_0 = arith.constant 0 : i32
    %c0_i32_1 = arith.constant 0 : i32
    return %c0_i32, %c0_i32_0 : i32, i32
  }
  func.func @transform_4(%arg0: i32) -> (i32, i32) {
    %c0_i32 = arith.constant 0 : i32
    %c0_i32_0 = arith.constant 0 : i32
    %c0_i32_1 = arith.constant 0 : i32
    return %c0_i32, %c0_i32_0 : i32, i32
  }
  func.func @transform_5(%arg0: i32) -> (i32, i32) {
    %c0_i32 = arith.constant 0 : i32
    %c0_i32_0 = arith.constant 0 : i32
    %c0_i32_1 = arith.constant 0 : i32
    return %c0_i32, %c0_i32_0 : i32, i32
  }
  func.func @transform_6(%arg0: i32) -> (i32, i32) {
    %c0_i32 = arith.constant 0 : i32
    %c0_i32_0 = arith.constant 0 : i32
    %c0_i32_1 = arith.constant 0 : i32
    return %c0_i32, %c0_i32_0 : i32, i32
  }
  func.func @transform_7(%arg0: i32) -> (i32, i32) {
    %c0_i32 = arith.constant 0 : i32
    %c0_i32_0 = arith.constant 0 : i32
    %c0_i32_1 = arith.constant 0 : i32
    return %c0_i32, %c0_i32_0 : i32, i32
  }
  func.func @transform_8(%arg0: i32) -> (i32, i32) {
    %c0_i32 = arith.constant 0 : i32
    %c0_i32_0 = arith.constant 0 : i32
    %c0_i32_1 = arith.constant 0 : i32
    return %c0_i32, %c0_i32_0 : i32, i32
  }
  func.func @transform_9(%arg0: i32) -> (i32, i32) {
    %c0_i32 = arith.constant 0 : i32
    %c0_i32_0 = arith.constant 0 : i32
    %c0_i32_1 = arith.constant 0 : i32
    return %c0_i32, %c0_i32_0 : i32, i32
  }
}

</mosaic_0001>

<bundles_post_ra>
// kernel: _lambda_.1
= control target key start
LH: loop header
LB: loop body
LE: loop exit
PB: predicated region body
PF: predicated region fallthrough
CT: control target
= control target key end

     0   :  { %s1271_s30 = smov 0   ;;  %s1469_s0 = inlined_call_operand.vmem [shape: bf16[2,256,36], index: 0, kind: input, shape index: {}]   ;;  %s1470_s1 = inlined_call_operand.vmem [shape: bf16[36,32], index: 1, kind: input, shape index: {}]   ;;  %s1471_s2 = inlined_call_operand.vmem [shape: f32[1,32], index: 2, kind: input, shape index: {}]   ;;  %s1472_s3 = inlined_call_operand.vmem [shape: bf16[32,32], index: 3, kind: input, shape index: {}]   ;;  %s1473_s4 = inlined_call_operand.vmem [shape: f32[1,32], index: 4, kind: input, shape index: {}]   ;;  %s1474_s5 = inlined_call_operand.vmem [shape: bf16[32,32], index: 5, kind: input, shape index: {}]   ;;  %s1475_s6 = inlined_call_operand.vmem [shape: f32[1,32], index: 6, kind: input, shape index: {}]   ;;  %s1476_s7 = inlined_call_operand.vmem [shape: bf16[32,128], index: 7, kind: input, shape index: {}]   ;;  %s1477_s8 = inlined_call_operand.vmem [shape: f32[1,128], index: 8, kind: input, shape index: {}]   ;;  %s1478_s9 = inlined_call_operand.vmem [shape: f32[2,128], index: 9, kind: output, shape index: {}]  }
   0x1 LB: > { %s1277_s10 = sadd.s32 4294967295, %s1217_s30   ;;  %p1019_p0 = scmp.ge.s32.totalorder %s1217_s30, 1  ;;  %s1217_s30 = sphi %s1271_s30, %s19_s30  }
   0x2   : > { %p282_p1 = scmp.lt.s32.totalorder %s1217_s30, 3 }
   0x4   : > { %p283_p2 = pnand %p1019_p0, %p282_p1 }
   0x5   : > { %v1186_v0 = vld [vmem:[%s1470_s1] sm:$0xff] (!%p283_p2)   ;;  %v1187_v1 = vld [vmem:[%s1470_s1 + $0x8] sm:$0xff] (!%p283_p2)   ;;  %p313_p3 = scmp.lt.s32.totalorder (!%p283_p2), %s1277_s10, 1  ;;  %v1188_v2 = vld [vmem:[%s1470_s1 + $0x10] ss:$0 sps:$4 sm:$0x33] (!%p283_p2)  }
   0x6   : > { %286 = sbr.rel (%p283_p2) target bundleno = 976 (0x3d0), region = 56  ;;  %1106 = vmatprep.subr.bf16.mxu0 (!%p283_p2), %v1186_v0  ;;  %1168 = vmatprep.subr.bf16.mxu1 (!%p283_p2), %v1186_v0  ;;  %vm507_vm0 = vcmask (!%p283_p2), 1041408   ;;  %vm458_vm1 = vcmask (!%p283_p2), 293888   ;;  %v1332_v20 = vld [vmem:[%s1471_s2] ss:$0 sm:$0xff] (!%p283_p2)  ;;  %vm704_vm2 = vcmask (!%p283_p2), 261120  }
   0x7   : > { %1107 = vmatpush3.bf16.msra.mxu0 (!%p283_p2), %v1186_v0  ;;  %1171 = vmatpush3.bf16.msra.mxu1 (!%p283_p2), %v1186_v0  ;;  %v509_v4 = vsel (!%p283_p2), %vm507_vm0, %v1188_v2, 0  ;;  %vm776_vm3 = vcmask (!%p283_p2), 253952   ;;  %s1075_s24 = scalar_lea.vmem (!%p283_p2), [#allocation2], %s1217_s30  ;;  %p1059_p4 = scmp.ne.s32.totalorder (!%p283_p2), %s1277_s10, 1 }
   0x8   : > { %1108 = vmatprep.subr.bf16.mxu0 (!%p283_p2), %v1187_v1  ;;  %1169 = vmatprep.subr.bf16.mxu1 (!%p283_p2), %v1187_v1 }
   0xb   : > { %1109 = vmatpush3.bf16.msra.mxu0 (!%p283_p2), %v1187_v1  ;;  %1172 = vmatpush3.bf16.msra.mxu1 (!%p283_p2), %v1187_v1 }
   0xc   : > { %1174 = vmatprep.subr.msk.bf16.mxu0 (!%p283_p2), %vm507_vm0, %v1188_v2  ;;  %1175 = vmatprep.subr.msk.bf16.mxu1 (!%p283_p2), %vm507_vm0, %v1188_v2 }
   0xd   : > { %s314_s15 = scalar_select %p313_p3, %s1277_s10, 1 }
   0xe   : > { %vm1220_vm4 = vmmov (!%p1059_p4), 0  }
   0xf   : > { %s1074_s18 = sshll.u32 %s314_s15, 7  ;;  %1111 = vmatpush3.bf16.msra.mxu0 %v509_v4  ;;  %1173 = vmatpush3.bf16.msra.mxu1 %v509_v4 }
  0x10   : > { %s1295_s21 = scalar_lea.vmem %s1469_s0, %s1074_s18 }
  0x11   : > { %v1189_v3 = vld [vmem:[%s1295_s21] sm:$0xff]   ;;  %v1190_v5 = vld [vmem:[%s1295_s21 + $0x8] sm:$0xff]   ;;  %v1191_v6 = vld [vmem:[%s1295_s21 + $0x10] sm:$0xff]  }
  0x12   : > { %1112 = vmatprep.mubr.msk.bf16.mxu0 %vm458_vm1, %v1189_v3  ;;  %v1197_v7 = vld [vmem:[%s1295_s21 + $0x40] sm:$0xff]   ;;  %v1198_v8 = vld [vmem:[%s1295_s21 + $0x48] sm:$0xff]   ;;  %v1199_v9 = vld [vmem:[%s1295_s21 + $0x50] sm:$0xff]  }
  0x13   : > { %1113 = vmatmul.mubr.msk.bf16.vlgmr.msra.gmra.mrb[0].mxu0 %vm458_vm1, %v1190_v5  ;;  %1128 = vmatprep.mubr.msk.bf16.mxu1 %vm458_vm1, %v1197_v7  ;;  %v1192_v10 = vld [vmem:[%s1295_s21 + $0x18] sm:$0xff]   ;;  %v1193_v11 = vld [vmem:[%s1295_s21 + $0x20] sm:$0xff]   ;;  %v1194_v14 = vld [vmem:[%s1295_s21 + $0x28] sm:$0xff]  }
  0x14   : > { %1116 = vmatprep.mubr.msk.bf16.mxu0 %vm458_vm1, %v1191_v6  ;;  %1129 = vmatmul.mubr.msk.bf16.vlgmr.msra.gmra.mrb[0].mxu1 %vm458_vm1, %v1198_v8  ;;  %v1200_v12 = vld [vmem:[%s1295_s21 + $0x58] sm:$0xff]   ;;  %v1201_v13 = vld [vmem:[%s1295_s21 + $0x60] sm:$0xff]   ;;  %v1195_v15 = vld [vmem:[%s1295_s21 + $0x30] sm:$0xff]  }
  0x15   : > { %1132 = vmatprep.mubr.msk.bf16.mxu1 %vm458_vm1, %v1199_v9  ;;  %v1202_v16 = vld [vmem:[%s1295_s21 + $0x68] sm:$0xff]   ;;  %v1203_v17 = vld [vmem:[%s1295_s21 + $0x70] sm:$0xff]   ;;  %v1196_v18 = vld [vmem:[%s1295_s21 + $0x38] sm:$0xff]  }
  0x16   : > { %v1204_v19 = vld [vmem:[%s1295_s21 + $0x78] sm:$0xff]  }
  0x1b   : > { %1117 = vmatmul.mubr.msk.bf16.gmra.mrb[4].mxu0 %vm458_vm1, %v1192_v10 }
  0x1c   : > { %1120 = vmatprep.mubr.msk.bf16.mxu0 %vm458_vm1, %v1193_v11  ;;  %1133 = vmatmul.mubr.msk.bf16.gmra.mrb[4].mxu1 %vm458_vm1, %v1200_v12 }
  0x1d   : > { %1136 = vmatprep.mubr.msk.bf16.mxu1 %vm458_vm1, %v1201_v13 }
  0x23   : > { %1121 = vmatmul.mubr.msk.bf16.gmra.mrb[8].mxu0 %vm458_vm1, %v1194_v14 }
  0x24   : > { %1124 = vmatprep.mubr.msk.bf16.mxu0 %vm458_vm1, %v1195_v15  ;;  %1137 = vmatmul.mubr.msk.bf16.gmra.mrb[8].mxu1 %vm458_vm1, %v1202_v16 }
  0x25   : > { %1140 = vmatprep.mubr.msk.bf16.mxu1 %vm458_vm1, %v1203_v17 }
  0x2b   : > { %1125 = vmatmul.mubr.msk.bf16.gmra.mrb[12].mxu0 %vm458_vm1, %v1196_v18 }
  0x2c   : > { %1141 = vmatmul.mubr.msk.bf16.gmra.mrb[12].mxu1 %vm458_vm1, %v1204_v19 }
  0xe6   : > { %v1114_v21 = vpop.f32.mrb[0].mxu0 }
  0xe7   : > { %v545_v22 = vpop.f32.mrb[1].mxu0  ;;  %v554_v23 = vadd.f32 %v1114_v21, %v1332_v20  ;;  %v1338_v30 = vpop.f32.mrb[0].mxu1 }
  0xe8   : > { %v546_v24 = vadd.f32 %v1332_v20, %v545_v22  ;;  %v1115_v25 = vpop.f32.mrb[2].mxu0  ;;  %v1340_v31 = vpop.f32.mrb[1].mxu1 }
  0xe9   : > { %v548_v26 = vpop.f32.mrb[3].mxu0  ;;  %v557_v28 = vadd.f32 %v1115_v25, %v1332_v20  ;;  %v674_v32 = vmax.f32 %v554_v23, 0.0  ;;  %v1342_v34 = vpop.f32.mrb[2].mxu1 }
  0xea   : > { %v672_v27 = vmax.f32 %v546_v24, 0.0  ;;  %v549_v29 = vadd.f32 %v1332_v20, %v548_v26  ;;  %v1344_v35 = vpop.f32.mrb[3].mxu1 }
  0xeb   : > { %v675_v37 = vmax.f32 %v557_v28, 0.0  ;;  %v708_v42 = vsel %vm704_vm2, %v674_v32, 0.0 }
  0xec   : > { %v673_v33 = vmax.f32 %v549_v29, 0.0  ;;  %v705_v36 = vsel %vm704_vm2, %v672_v27, 0.0 }
  0xed   : > { %v710_v48 = vsel %vm704_vm2, %v675_v37, 0.0  ;;  %v610_v37 = vadd.f32 %v1332_v20, %v1340_v31 }
  0xee   : > { %v706_v38 = vsel %vm704_vm2, %v673_v33, 0.0  ;;  %v1118_v39 = vpop.f32.mrb[4].mxu0 }
  0xef   : > { %v707_v40 = vadd.f32 %v706_v38, %v705_v36  ;;  %v561_v41 = vpop.f32.mrb[5].mxu0  ;;  %v570_v43 = vadd.f32 %v1118_v39, %v1332_v20  ;;  %v1354_v52 = vpop.f32.mrb[4].mxu1 }
  0xf0   : > { %v562_v44 = vadd.f32 %v1332_v20, %v561_v41  ;;  %v1119_v45 = vpop.f32.mrb[6].mxu0  ;;  %v1356_v54 = vpop.f32.mrb[5].mxu1 }
  0xf1   : > { %v709_v46 = vadd.f32 %v708_v42, %v707_v40  ;;  %v564_v47 = vpop.f32.mrb[7].mxu0  ;;  %v573_v50 = vadd.f32 %v1119_v45, %v1332_v20  ;;  %v678_v55 = vmax.f32 %v570_v43, 0.0  ;;  %v1359_v58 = vpop.f32.mrb[6].mxu1 }
  0xf2   : > { %v676_v49 = vmax.f32 %v562_v44, 0.0  ;;  %v565_v51 = vadd.f32 %v1332_v20, %v564_v47  ;;  %v1361_v60 = vpop.f32.mrb[7].mxu1 }
  0xf3   : > { %v711_v53 = vadd.f32 %v710_v48, %v709_v46  ;;  %v679_v61 = vmax.f32 %v573_v50, 0.0  ;;  %v716_v2 = vsel %vm704_vm2, %v678_v55, 0.0  ;;  %v613_v55 = vadd.f32 %v1332_v20, %v1344_v35 }
  0xf4   : > { %v712_v56 = vsel %vm704_vm2, %v676_v49, 0.0  ;;  %v677_v57 = vmax.f32 %v565_v51, 0.0 }
  0xf5   : > { %v713_v59 = vadd.f32 %v712_v56, %v711_v53  ;;  %v718_v8 = vsel %vm704_vm2, %v679_v61, 0.0  ;;  %v688_v53 = vmax.f32 %v610_v37, 0.0 }
  0xf6   : > { %v714_v62 = vsel %vm704_vm2, %v677_v57, 0.0  ;;  %v1122_v63 = vpop.f32.mrb[8].mxu0 }
  0xf7   : > { %v715_v0 = vadd.f32 %v714_v62, %v713_v59  ;;  %v577_v1 = vpop.f32.mrb[9].mxu0  ;;  %v586_v3 = vadd.f32 %v1122_v63, %v1332_v20  ;;  %v1370_v12 = vpop.f32.mrb[8].mxu1  ;;  %v618_v59 = vadd.f32 %v1338_v30, %v1332_v20  ;;  %v621_v62 = vadd.f32 %v1342_v34, %v1332_v20 }
  0xf8   : > { %v578_v4 = vadd.f32 %v1332_v20, %v577_v1  ;;  %v1123_v5 = vpop.f32.mrb[10].mxu0  ;;  %v641_v14 = vpop.f32.mrb[9].mxu1  ;;  %v689_v1 = vmax.f32 %v613_v55, 0.0  ;;  %v629_v30 = vadd.f32 %v1332_v20, %v1361_v60 }
  0xf9   : > { %v717_v6 = vadd.f32 %v716_v2, %v715_v0  ;;  %v580_v7 = vpop.f32.mrb[11].mxu0  ;;  %v589_v10 = vadd.f32 %v1123_v5, %v1332_v20  ;;  %v682_v15 = vmax.f32 %v586_v3, 0.0  ;;  %v1373_v18 = vpop.f32.mrb[10].mxu1  ;;  %v736_v0 = vsel %vm704_vm2, %v688_v53, 0.0 }
  0xfa   : > { %v680_v9 = vmax.f32 %v578_v4, 0.0  ;;  %v581_v11 = vadd.f32 %v1332_v20, %v580_v7  ;;  %v644_v21 = vpop.f32.mrb[11].mxu1  ;;  %v626_v2 = vadd.f32 %v1332_v20, %v1356_v54  ;;  %v690_v35 = vmax.f32 %v618_v59, 0.0 }
  0xfb   : > { %v719_v13 = vadd.f32 %v718_v8, %v717_v6  ;;  %v683_v22 = vmax.f32 %v589_v10, 0.0  ;;  %v724_v27 = vsel %vm704_vm2, %v682_v15, 0.0  ;;  %v691_v5 = vmax.f32 %v621_v62, 0.0 }
  0xfc   : > { %v720_v16 = vsel %vm704_vm2, %v680_v9, 0.0  ;;  %v681_v17 = vmax.f32 %v581_v11, 0.0  ;;  %v738_v6 = vsel %vm704_vm2, %v689_v1, 0.0  ;;  %v692_v7 = vmax.f32 %v626_v2, 0.0 }
  0xfd   : > { %v721_v19 = vadd.f32 %v720_v16, %v719_v13  ;;  %v726_v38 = vsel %vm704_vm2, %v683_v22, 0.0  ;;  %v740_v34 = vsel %vm704_vm2, %v690_v35, 0.0  ;;  %v634_v9 = vadd.f32 %v1354_v52, %v1332_v20 }
  0xfe   : > { %v722_v23 = vsel %vm704_vm2, %v681_v17, 0.0  ;;  %v1126_v24 = vpop.f32.mrb[12].mxu0  ;;  %v637_v54 = vadd.f32 %v1359_v58, %v1332_v20  ;;  %v742_v11 = vsel %vm704_vm2, %v691_v5, 0.0  ;;  %v744_v13 = vsel %vm704_vm2, %v692_v7, 0.0  ;;  %v1207_v7 = vld [vmem:[%s1474_s5] sm:$0xff] (!%p1059_p4)  }
  0xff   : > { %v723_v25 = vadd.f32 %v722_v23, %v721_v19  ;;  %v593_v26 = vpop.f32.mrb[13].mxu0  ;;  %v602_v28 = vadd.f32 %v1126_v24, %v1332_v20  ;;  %v1384_v42 = vpop.f32.mrb[12].mxu1  ;;  %v693_v15 = vmax.f32 %v629_v30, 0.0  ;;  %v642_v16 = vadd.f32 %v1332_v20, %v641_v14  ;;  %v1208_v30 = vld [vmem:[%s1474_s5 + $0x8] sm:$0xff] (!%p1059_p4)  }
 0x100   : > { %v594_v29 = vadd.f32 %v1332_v20, %v593_v26  ;;  %v1127_v32 = vpop.f32.mrb[14].mxu0  ;;  %v657_v44 = vpop.f32.mrb[13].mxu1  ;;  %v694_v19 = vmax.f32 %v634_v9, 0.0  ;;  %v695_v22 = vmax.f32 %v637_v54, 0.0  ;;  %v645_v52 = vadd.f32 %v1332_v20, %v644_v21 }
 0x101   : > { %v725_v33 = vadd.f32 %v724_v27, %v723_v25  ;;  %v596_v36 = vpop.f32.mrb[15].mxu0  ;;  %v605_v40 = vadd.f32 %v1127_v32, %v1332_v20  ;;  %v686_v45 = vmax.f32 %v602_v28, 0.0  ;;  %v1143_v48 = vpop.f32.mrb[14].mxu1  ;;  %v746_v23 = vsel %vm704_vm2, %v693_v15, 0.0 }
 0x102   : > { %v684_v39 = vmax.f32 %v594_v29, 0.0  ;;  %v597_v41 = vadd.f32 %v1332_v20, %v596_v36  ;;  %v660_v50 = vpop.f32.mrb[15].mxu1  ;;  %v696_v24 = vmax.f32 %v642_v16, 0.0  ;;  %v748_v26 = vsel %vm704_vm2, %v694_v19, 0.0  ;;  %v1064_v19 = vld [vmem:[%s1475_s6] ss:$0 sm:$0xff] (!%p1059_p4) }
 0x103   : > { %v727_v43 = vadd.f32 %v726_v38, %v725_v33  ;;  %v687_v51 = vmax.f32 %v605_v40, 0.0  ;;  %v732_v57 = vsel %vm704_vm2, %v686_v45, 0.0  ;;  %v650_v58 = vadd.f32 %v1370_v12, %v1332_v20 }
 0x104   : > { %v728_v46 = vsel %vm704_vm2, %v684_v39, 0.0  ;;  %v685_v47 = vmax.f32 %v597_v41, 0.0  ;;  %v750_v27 = vsel %vm704_vm2, %v695_v22, 0.0  ;;  %v752_v14 = vsel %vm704_vm2, %v696_v24, 0.0 }
 0x105   : > { %v729_v49 = vadd.f32 %v728_v46, %v727_v43  ;;  %v734_v63 = vsel %vm704_vm2, %v687_v51, 0.0  ;;  %v653_v29 = vadd.f32 %v1373_v18, %v1332_v20  ;;  %v697_v32 = vmax.f32 %v645_v52, 0.0 }
 0x106   : > { %v730_v31 = vsel %vm704_vm2, %v685_v47, 0.0  ;;  %v658_v33 = vadd.f32 %v1332_v20, %v657_v44  ;;  %v698_v37 = vmax.f32 %v650_v58, 0.0  ;;  %v661_v12 = vadd.f32 %v1332_v20, %v660_v50  ;;  %v1068_v58 = vld [vmem:[%s1477_s8] ss:$0 sm:$0xff] (!%p1059_p4) }
 0x107   : > { %v731_v56 = vadd.f32 %v730_v31, %v729_v49  ;;  %v699_v38 = vmax.f32 %v653_v29, 0.0  ;;  %v754_v39 = vsel %vm704_vm2, %v697_v32, 0.0  ;;  %v666_v45 = vadd.f32 %v1384_v42, %v1332_v20 }
 0x108   : > { %v700_v40 = vmax.f32 %v658_v33, 0.0  ;;  %v756_v43 = vsel %vm704_vm2, %v698_v37, 0.0  ;;  %v669_v47 = vadd.f32 %v1143_v48, %v1332_v20  ;;  %v701_v49 = vmax.f32 %v661_v12, 0.0 }
 0x109   : > { %v733_v61 = vadd.f32 %v732_v57, %v731_v56  ;;  %v758_v18 = vsel %vm704_vm2, %v699_v38, 0.0  ;;  %v702_v31 = vmax.f32 %v666_v45, 0.0  ;;  %v1219_v35 = vmov (!%p1059_p4), 0.0  }
 0x10a   : > { %v760_v44 = vsel %vm704_vm2, %v700_v40, 0.0  ;;  %v703_v55 = vmax.f32 %v669_v47, 0.0  ;;  %v762_v50 = vsel %vm704_vm2, %v701_v49, 0.0  ;;  %1144 = vmatprep.subr.bf16.mxu0 (!%p1059_p4), %v1219_v35  ;;  %1152 = vmatprep.subr.bf16.mxu1 (!%p1059_p4), %v1219_v35 }
 0x10b   : > { %v735_v3 = vadd.f32 %v734_v63, %v733_v61  ;;  %v764_v57 = vsel %vm704_vm2, %v702_v31, 0.0  ;;  %1148 = vmatprep.mubr.msk.bf16.mxu0 (!%p1059_p4), %vm1220_vm4, %v1219_v35  ;;  %1156 = vmatprep.mubr.msk.bf16.mxu1 (!%p1059_p4), %vm1220_vm4, %v1219_v35 }
 0x10c   : > { %v766_v42 = vsel %vm704_vm2, %v703_v55, 0.0  ;;  %1153 = vmatpush3.bf16.msra.mxu1 (!%p1059_p4), %v1207_v7 }
 0x10d   : > { %v737_v4 = vadd.f32 %v736_v0, %v735_v3  ;;  %v1205_v3 = vld [vmem:[%s1472_s3] sm:$0xff] (!%p1059_p4)   ;;  %1154 = vmatprep.subr.bf16.mxu1 (!%p1059_p4), %v1219_v35 }
 0x10e   : > { %1145 = vmatpush3.bf16.msra.mxu0 (!%p1059_p4), %v1205_v3 }
 0x10f   : > { %v739_v8 = vadd.f32 %v738_v6, %v737_v4  ;;  %v1206_v4 = vld [vmem:[%s1472_s3 + $0x8] sm:$0xff] (!%p1059_p4)   ;;  %1146 = vmatprep.subr.bf16.mxu0 (!%p1059_p4), %v1219_v35 }
 0x110   : > { %1155 = vmatpush3.bf16.msra.mxu1 (!%p1059_p4), %v1208_v30 }
 0x111   : > { %v741_v10 = vadd.f32 %v740_v34, %v739_v8  ;;  %v1209_v8 = vld [vmem:[%s1476_s7] sm:$0xff] (!%p1059_p4)  }
 0x112   : > { %1147 = vmatpush3.bf16.msra.mxu0 (!%p1059_p4), %v1206_v4  ;;  %v1060_v34 = vld [vmem:[%s1473_s4] ss:$0 sm:$0xff] (!%p1059_p4) }
 0x113   : > { %v743_v17 = vadd.f32 %v742_v11, %v741_v10  ;;  %1160 = vmatprep.subr.bf16.mxu0 (!%p1059_p4), %v1219_v35 }
 0x115   : > { %v745_v60 = vadd.f32 %v744_v13, %v743_v17  ;;  %v1210_v17 = vld [vmem:[%s1476_s7 + $0x8] sm:$0xff] (!%p1059_p4)  }
 0x117   : > { %v747_v25 = vadd.f32 %v746_v23, %v745_v60 }
 0x119   : > { %v749_v28 = vadd.f32 %v748_v26, %v747_v25 }
 0x11b   : > { %v751_v36 = vadd.f32 %v750_v27, %v749_v28 }
 0x11d   : > { %v753_v21 = vadd.f32 %v752_v14, %v751_v36 }
 0x11f   : > { %v755_v41 = vadd.f32 %v754_v39, %v753_v21 }
 0x121   : > { %v757_v46 = vadd.f32 %v756_v43, %v755_v41 }
 0x123   : > { %v759_v51 = vadd.f32 %v758_v18, %v757_v46 }
 0x125   : > { %v761_v53 = vadd.f32 %v760_v44, %v759_v51 }
 0x127   : > { %v763_v56 = vadd.f32 %v762_v50, %v761_v53 }
 0x129   : > { %v765_v59 = vadd.f32 %v764_v57, %v763_v56 }
 0x12b   : > { %v767_v61 = vadd.f32 %v766_v42, %v765_v59 }
 0x12d   : > { %v768_v62 = vrot.slane %v767_v61, 4 }
 0x12f   : > { %v769_v63 = vadd.f32 %v768_v62, %v767_v61 }
 0x131   : > { %v770_v0 = vrot.slane %v769_v63, 2 }
 0x133   : > { %v771_v1 = vadd.f32 %v770_v0, %v769_v63 }
 0x135   : > { %v772_v20 = vrot.slane %v771_v1, 1  ;;  %781 = sbr.rel (%p1059_p4) target bundleno = 976 (0x3d0), region = 60 }
 0x137   : > { %v773_v48 = vadd.f32 %v772_v20, %v771_v1 }
 0x139   : > { %v774_v2 = vmul.f32 0.00390625, %v773_v48 }
 0x13b   : > { %1077 = vst.msk [vmem:[%s1075_s24 - $0x1] sm:$0x1] %vm776_vm3, %v774_v2 }
 0x142   : > { %v782_v5 = vld [vmem:[#allocation2] sm:$0x3] }
 0x143   : > { %v783_v6 = vpack.c.bf16 %v782_v5, %v782_v5 }
 0x145   : > { %1149 = vmatmul.mubr.msk.bf16.vlgmr.msra.gmra.mrb[0].mxu0 %vm704_vm2, %v783_v6 }
 0x146   : > { %1164 = vmatprep.mubr.msk.bf16.mxu0 %vm1220_vm4, %v1219_v35  ;;  %1161 = vmatpush3.bf16.msra.mxu0 %v1209_v8 }
 0x147   : > { %1162 = vmatprep.subr.bf16.mxu0 %v1219_v35 }
 0x14a   : > { %1163 = vmatpush3.bf16.msra.mxu0 %v1210_v17 }
 0x218   : > { %v844_v9 = vpop.f32.mrb[0].mxu0 }
 0x219   : > { %v845_v10 = vadd.f32 %v1060_v34, %v844_v9  ;;  %v1150_v54 = vpop.f32.mrb[1].mxu0 }
 0x21a   : > { %v847_v11 = vpop.f32.mrb[2].mxu0 }
 0x21b   : > { %v850_v13 = vmax.f32 %v845_v10, 0.0  ;;  %v1151_v15 = vpop.f32.mrb[3].mxu0 }
 0x21d   : > { %v851_v16 = vpack.c.bf16 %v850_v13, %v850_v13 }
 0x21f   : > { %1157 = vmatmul.mubr.msk.bf16.vlgmr.msra.gmra.mrb[0].mxu1 %vm704_vm2, %v851_v16 }
 0x2f2   : > { %v912_v60 = vpop.f32.mrb[0].mxu1 }
 0x2f3   : > { %v913_v22 = vadd.f32 %v1064_v19, %v912_v60  ;;  %v1158_v23 = vpop.f32.mrb[1].mxu1 }
 0x2f4   : > { %v915_v24 = vpop.f32.mrb[2].mxu1 }
 0x2f5   : > { %v918_v52 = vmax.f32 %v913_v22, 0.0  ;;  %v1159_v25 = vpop.f32.mrb[3].mxu1 }
 0x2f7   : > { %v919_v26 = vpack.c.bf16 %v918_v52, %v918_v52 }
 0x2f9   : > { %1165 = vmatmul.mubr.msk.bf16.vlgmr.msra.gmra.mrb[4].mxu0 %vm704_vm2, %v919_v26 }
 0x3cc   : > { %v980_v27 = vpop.f32.mrb[4].mxu0 }
 0x3cd   : > { %v981_v28 = vadd.f32 %v1068_v58, %v980_v27  ;;  %v1166_v14 = vpop.f32.mrb[5].mxu0 }
 0x3ce   : > { %v983_v29 = vpop.f32.mrb[6].mxu0 }
 0x3cf   : > { %986 = vst [vmem:[%s1478_s9] sm:$0x3] %v981_v28  ;;  %v1167_v32 = vpop.f32.mrb[7].mxu0 }
 0x3d0 PF: > { %s19_s30 = sadd.s32 1, %s1217_s30  }
 0x3d1   : > { %p16_p5 = scmp.ge.s32.totalorder %s19_s30, 4  }
 0x3d3   :  { %18 = sbr.rel (!%p16_p5) target bundleno = 1 (0x1), region = 87 }

</bundles_post_ra>
